<compile_context>
chip_gen: v6e
topology: v6e:2x2x1
jax: 0.10.0
libtpu: 0.0.40
codegen_flags: <defaults>
</compile_context>

<pallas_src>
import functools

import jax
import jax.numpy as jnp
from jax.experimental import pallas as pl
from jax.experimental.pallas import tpu as pltpu

H1, H2, H3, H4 = 100, 50, 30, 1   # hidden sizes from the PyTorch module
LANE = 128                        # TPU lane width; all hidden dims pad to this


def _round_up(x, m):
    return (x + m - 1) // m * m


def _align_for(dtype):
    # f32 native sublane tile is 8 rows; sub-32-bit dtypes pack 16 rows/vreg.
    return 16 if jnp.dtype(dtype).itemsize < 4 else 8


def critic_kernel(s_ref, a_ref, w_ref, o_ref, *, s_pad, a_pad):
    """One batch tile: four MXU matmuls + bias + ReLU, all operands in VMEM.

    Slab row layout (all sub-blocks alignment-padded, padding rows/cols zero):
      [0 : s_pad)              W1 rows for s
      [s_pad : off)            W1 rows for a
      [off : off+128)          W2   (100 x 50 in top-left)
      [off+128 : off+256)      W3   (50 x 30 in top-left)
      [off+256 : off+256+8)    tail tile: row0 = w4^T, rows1..4 = b1..b4
    """
    off = s_pad + a_pad
    tail = off + 2 * LANE
    wdt = w_ref.dtype                                  # f32 or bf16 operands

    tail_nat = w_ref[tail:tail + 8, :]                 # [w4^T; b1; b2; b3; b4; 0..]
    tail_f32 = tail_nat.astype(jnp.float32)

    # Layer 1: concat(s, a) @ W1 == s @ W1_s + a @ W1_a  (no concat needed).
    h = jnp.dot(s_ref[...].astype(wdt), w_ref[0:s_pad, :],
                preferred_element_type=jnp.float32)
    h = h + jnp.dot(a_ref[...].astype(wdt), w_ref[s_pad:off, :],
                    preferred_element_type=jnp.float32)
    h = jnp.maximum(h + tail_f32[1:2, :], 0.0)         # (TB, 128); lanes >= 100 stay 0

    # Layers 2-3: padded rows/cols/bias-lanes are zero, so padding is inert.
    h = jnp.dot(h.astype(wdt), w_ref[off:off + LANE, :],
                preferred_element_type=jnp.float32)
    h = jnp.maximum(h + tail_f32[2:3, :], 0.0)
    h = jnp.dot(h.astype(wdt), w_ref[off + LANE:off + 2 * LANE, :],
                preferred_element_type=jnp.float32)
    h = jnp.maximum(h + tail_f32[3:4, :], 0.0)         # (TB, 128); lanes >= 30 are 0

    # Layer 4, transposed (q^T = w4^T @ h^T): the store becomes a lane-dense
    # (1, TB) row instead of a masked 1-of-128-lane (TB, 1) column.  The
    # (128, TB) transpose rides the otherwise-idle XLU slot.
    q_t = jnp.dot(tail_nat[0:1, :], h.astype(wdt).T,
                  preferred_element_type=jnp.float32)  # (1, TB)
    q_t = q_t + tail_f32[4:5, 0:1]                     # scalar bias b4 (broadcast)
    o_ref[...] = q_t.astype(o_ref.dtype)


def init_critic_params(key, s_dim, a_dim):
    """Matches nn.init.normal_(w, 0.0, 0.1), nn.init.constant_(b, 0.1).
    Weights are stored [in, out] (transposed vs PyTorch) so x @ W applies."""
    dims = [(s_dim + a_dim, H1), (H1, H2), (H2, H3), (H3, H4)]
    params = {}
    for i, (fin, fout) in enumerate(dims, start=1):
        key, sub = jax.random.split(key)
        params[f"w{i}"] = 0.1 * jax.random.normal(sub, (fin, fout), dtype=jnp.float32)
        params[f"b{i}"] = jnp.full((fout,), 0.1, dtype=jnp.float32)
    return params


def pack_params(params, s_dim, a_dim, dtype=jnp.float32):
    """Pack the 4 weights + 4 biases into ONE lane-padded slab (zero padding).
    Done once at init so the kernel sees a single parameter operand (1 DMA).
    Any training-time parameter update must re-pack to preserve the zeros."""
    al = _align_for(dtype)
    s_pad = _round_up(s_dim, al)
    a_pad = _round_up(a_dim, al)
    off = s_pad + a_pad
    tail = off + 2 * LANE

    w = jnp.zeros((tail + al, LANE), jnp.float32)
    w = w.at[0:s_dim, 0:H1].set(params["w1"][:s_dim])               # W1 rows for s
    w = w.at[s_pad:s_pad + a_dim, 0:H1].set(params["w1"][s_dim:])   # W1 rows for a
    w = w.at[off:off + H1, 0:H2].set(params["w2"])
    w = w.at[off + LANE:off + LANE + H2, 0:H3].set(params["w3"])
    w = w.at[tail, 0:H3].set(params["w4"][:, 0])                    # w4^T as a row
    w = w.at[tail + 1, 0:H1].set(params["b1"])
    w = w.at[tail + 2, 0:H2].set(params["b2"])
    w = w.at[tail + 3, 0:H3].set(params["b3"])
    w = w.at[tail + 4, 0:1].set(params["b4"])
    return w.astype(dtype)


def critic_net(s, a, w_slab, *, s_dim, a_dim):
    B = s.shape[0]
    al = _align_for(w_slab.dtype)
    s_pad = _round_up(s_dim, al)
    a_pad = _round_up(a_dim, al)

    # Keep in-kernel slab slices alignment-friendly: pad feature columns only
    # when needed (padded slab rows are zero, so padded columns are inert).
    if s.shape[1] != s_pad:
        s = jnp.pad(s, ((0, 0), (0, s_pad - s.shape[1])))
    if a.shape[1] != a_pad:
        a = jnp.pad(a, ((0, 0), (0, a_pad - a.shape[1])))

    # Batch tile: 256 rows amortizes the ~0.35us/step grid overhead and fills
    # the 256-wide MXU on v6e/v7x while staying spill-safe on v5e; B > 256
    # still yields grid >= 2 so "parallel" can shard across v7x's two TCs.
    TB = min(256, _round_up(max(B, 1), 8))
    G = pl.cdiv(B, TB)

    kernel = functools.partial(critic_kernel, s_pad=s_pad, a_pad=a_pad)
    out = pl.pallas_call(
        kernel,
        # Lane-dense output: one row, G*TB lanes; sliced back to (B, 1) below.
        out_shape=jax.ShapeDtypeStruct((1, G * TB), jnp.float32),
        grid=(G,),
        in_specs=[
            pl.BlockSpec((TB, s_pad), lambda i: (i, 0)),
            pl.BlockSpec((TB, a_pad), lambda i: (i, 0)),
            # Constant block index => slab is DMA'd once and stays VMEM-resident.
            pl.BlockSpec(w_slab.shape, lambda i: (0, 0)),
        ],
        out_specs=pl.BlockSpec((1, TB), lambda i: (0, i)),
        compiler_params=pltpu.CompilerParams(
            dimension_semantics=("parallel",)),
    )(s, a, w_slab)
    return out[0, :B].reshape(B, 1)


def critic_net_ref(s, a, params):
    x = jnp.concatenate([s, a], axis=1).astype(jnp.float32)
    h = jnp.maximum(x @ params["w1"] + params["b1"], 0.0)
    h = jnp.maximum(h @ params["w2"] + params["b2"], 0.0)
    h = jnp.maximum(h @ params["w3"] + params["b3"], 0.0)
    return h @ params["w4"] + params["b4"]


if __name__ == "__main__":
    key = jax.random.PRNGKey(0)
    k_p, k_s, k_a, k_s2, k_a2 = jax.random.split(key, 5)

    B, s_dim, a_dim = 8, 16, 8
    s = jax.random.normal(k_s, (B, s_dim), dtype=jnp.float32)
    a = jax.random.normal(k_a, (B, a_dim), dtype=jnp.float32)

    params = init_critic_params(k_p, s_dim, a_dim)
    q_ref = critic_net_ref(s, a, params)

    # f32-operand path: strict check against the f32 reference.
    w32 = pack_params(params, s_dim, a_dim, dtype=jnp.float32)
    q = jax.block_until_ready(critic_net(s, a, w32, s_dim=s_dim, a_dim=a_dim))
    assert q.shape == (B, 1)
    assert jnp.allclose(q, q_ref, atol=1e-4, rtol=1e-4), "f32 mismatch vs reference"

    # Multi-tile path (TB=256, grid=2, ragged last tile) at a training-size batch.
    B2 = 300
    s2 = jax.random.normal(k_s2, (B2, s_dim), dtype=jnp.float32)
    a2 = jax.random.normal(k_a2, (B2, a_dim), dtype=jnp.float32)
    q2 = jax.block_until_ready(critic_net(s2, a2, w32, s_dim=s_dim, a_dim=a_dim))
    assert q2.shape == (B2, 1)
    assert jnp.allclose(q2, critic_net_ref(s2, a2, params), atol=1e-4, rtol=1e-4), \
        "f32 multi-tile mismatch vs reference"

    # bf16-operand path (f32 accumulation): ~3x fewer MXU passes, half the
    # weight DMA bytes on v6e/v7x.  Checked against the f32 reference at a
    # tolerance consistent with bf16 operand rounding.
    wbf = pack_params(params, s_dim, a_dim, dtype=jnp.bfloat16)
    qb = jax.block_until_ready(critic_net(s, a, wbf, s_dim=s_dim, a_dim=a_dim))
    assert qb.shape == (B, 1)
    assert jnp.allclose(qb, q_ref, atol=5e-2, rtol=5e-2), "bf16 mismatch vs reference"

    print("KERNEL_OK")
</pallas_src>

<mosaic_0001>
module attributes {stable_mosaic.version = 11 : i64} {
  func.func @critic_kernel(%arg0: i32, %arg1: memref<8x16xf32, #tpu.memory_space<vmem>>, %arg2: memref<8x8xf32, #tpu.memory_space<vmem>>, %arg3: memref<288x128xf32, #tpu.memory_space<vmem>>, %arg4: memref<1x8xf32, #tpu.memory_space<vmem>>) attributes {dimension_semantics = [#tpu.dimension_semantics<parallel>], iteration_bounds = array<i64: 1>, scalar_prefetch = 0 : i64, scratch_operands = 0 : i64, tpu.core_type = #tpu.core_type<tc>, window_params = [{transform_indices = @transform_0, window_bounds = array<i64: 8, 16>}, {transform_indices = @transform_1, window_bounds = array<i64: 8, 8>}, {pipeline_mode = #tpu.pipeline_mode<synchronous>, transform_indices = @transform_2, window_bounds = array<i64: 288, 128>}, {transform_indices = @transform_3, window_bounds = array<i64: 1, 8>}]} {
    %c280 = arith.constant 280 : index
    %c0 = arith.constant 0 : index
    %0 = vector.load %arg3[%c280, %c0] : memref<288x128xf32, #tpu.memory_space<vmem>>, vector<8x128xf32>
    %c0_0 = arith.constant 0 : index
    %c0_1 = arith.constant 0 : index
    %1 = vector.load %arg1[%c0_0, %c0_1] : memref<8x16xf32, #tpu.memory_space<vmem>>, vector<8x16xf32>
    %c0_2 = arith.constant 0 : index
    %c0_3 = arith.constant 0 : index
    %2 = vector.load %arg3[%c0_2, %c0_3] : memref<288x128xf32, #tpu.memory_space<vmem>>, vector<16x128xf32>
    %cst = arith.constant dense<0.000000e+00> : vector<8x128xf32>
    %3 = tpu.matmul %1, %2, %cst {dimension_numbers = #tpu.dot_dimension_numbers<[1], [0], [0], [1], [0, 0, 1, 1], [], []>} : vector<8x16xf32>, vector<16x128xf32>, vector<8x128xf32> -> vector<8x128xf32>
    %c0_4 = arith.constant 0 : index
    %c0_5 = arith.constant 0 : index
    %4 = vector.load %arg2[%c0_4, %c0_5] : memref<8x8xf32, #tpu.memory_space<vmem>>, vector<8x8xf32>
    %c16 = arith.constant 16 : index
    %c0_6 = arith.constant 0 : index
    %5 = vector.load %arg3[%c16, %c0_6] : memref<288x128xf32, #tpu.memory_space<vmem>>, vector<8x128xf32>
    %cst_7 = arith.constant dense<0.000000e+00> : vector<8x128xf32>
    %6 = tpu.matmul %4, %5, %cst_7 {dimension_numbers = #tpu.dot_dimension_numbers<[1], [0], [0], [1], [0, 0, 1, 1], [], []>} : vector<8x8xf32>, vector<8x128xf32>, vector<8x128xf32> -> vector<8x128xf32>
    %7 = arith.addf %3, %6 : vector<8x128xf32>
    %8 = vector.extract_strided_slice %0 {offsets = [1, 0], sizes = [1, 128], strides = [1, 1]} : vector<8x128xf32> to vector<1x128xf32>
    %9 = vector.broadcast %8 : vector<1x128xf32> to vector<8x128xf32>
    %10 = arith.addf %7, %9 : vector<8x128xf32>
    %cst_8 = arith.constant 0.000000e+00 : f32
    %11 = vector.broadcast %cst_8 : f32 to vector<8x128xf32>
    %12 = arith.maximumf %10, %11 : vector<8x128xf32>
    %c24 = arith.constant 24 : index
    %c0_9 = arith.constant 0 : index
    %13 = vector.load %arg3[%c24, %c0_9] : memref<288x128xf32, #tpu.memory_space<vmem>>, vector<128x128xf32>
    %cst_10 = arith.constant dense<0.000000e+00> : vector<8x128xf32>
    %14 = tpu.matmul %12, %13, %cst_10 {dimension_numbers = #tpu.dot_dimension_numbers<[1], [0], [0], [1], [0, 0, 1, 1], [], []>} : vector<8x128xf32>, vector<128x128xf32>, vector<8x128xf32> -> vector<8x128xf32>
    %15 = vector.extract_strided_slice %0 {offsets = [2, 0], sizes = [1, 128], strides = [1, 1]} : vector<8x128xf32> to vector<1x128xf32>
    %16 = vector.broadcast %15 : vector<1x128xf32> to vector<8x128xf32>
    %17 = arith.addf %14, %16 : vector<8x128xf32>
    %cst_11 = arith.constant 0.000000e+00 : f32
    %18 = vector.broadcast %cst_11 : f32 to vector<8x128xf32>
    %19 = arith.maximumf %17, %18 : vector<8x128xf32>
    %c152 = arith.constant 152 : index
    %c0_12 = arith.constant 0 : index
    %20 = vector.load %arg3[%c152, %c0_12] : memref<288x128xf32, #tpu.memory_space<vmem>>, vector<128x128xf32>
    %cst_13 = arith.constant dense<0.000000e+00> : vector<8x128xf32>
    %21 = tpu.matmul %19, %20, %cst_13 {dimension_numbers = #tpu.dot_dimension_numbers<[1], [0], [0], [1], [0, 0, 1, 1], [], []>} : vector<8x128xf32>, vector<128x128xf32>, vector<8x128xf32> -> vector<8x128xf32>
    %22 = vector.extract_strided_slice %0 {offsets = [3, 0], sizes = [1, 128], strides = [1, 1]} : vector<8x128xf32> to vector<1x128xf32>
    %23 = vector.broadcast %22 : vector<1x128xf32> to vector<8x128xf32>
    %24 = arith.addf %21, %23 : vector<8x128xf32>
    %cst_14 = arith.constant 0.000000e+00 : f32
    %25 = vector.broadcast %cst_14 : f32 to vector<8x128xf32>
    %26 = arith.maximumf %24, %25 : vector<8x128xf32>
    %27 = vector.extract_strided_slice %0 {offsets = [0, 0], sizes = [1, 128], strides = [1, 1]} : vector<8x128xf32> to vector<1x128xf32>
    %28 = tpu.transpose %26, [1, 0] : vector<8x128xf32> -> vector<128x8xf32>
    %cst_15 = arith.constant dense<0.000000e+00> : vector<1x8xf32>
    %29 = tpu.matmul %27, %28, %cst_15 {dimension_numbers = #tpu.dot_dimension_numbers<[1], [0], [0], [1], [0, 0, 1, 1], [], []>} : vector<1x128xf32>, vector<128x8xf32>, vector<1x8xf32> -> vector<1x8xf32>
    %30 = vector.extract_strided_slice %0 {offsets = [4, 0], sizes = [1, 1], strides = [1, 1]} : vector<8x128xf32> to vector<1x1xf32>
    %31 = vector.broadcast %30 : vector<1x1xf32> to vector<1x8xf32>
    %32 = arith.addf %29, %31 : vector<1x8xf32>
    %c0_16 = arith.constant 0 : index
    %c0_17 = arith.constant 0 : index
    %33 = vector.load %arg4[%c0_16, %c0_17] : memref<1x8xf32, #tpu.memory_space<vmem>>, vector<1x8xf32>
    tpu.vector_store %arg4[%c0_16, %c0_17], %32 {strides = array<i32>} : memref<1x8xf32, #tpu.memory_space<vmem>>, vector<1x8xf32>,
    return
  }
  func.func @transform_0(%arg0: i32) -> (i32, i32) {
    %c0_i32 = arith.constant 0 : i32
    %c0_i32_0 = arith.constant 0 : i32
    return %arg0, %c0_i32 : i32, i32
  }
  func.func @transform_1(%arg0: i32) -> (i32, i32) {
    %c0_i32 = arith.constant 0 : i32
    %c0_i32_0 = arith.constant 0 : i32
    return %arg0, %c0_i32 : i32, i32
  }
  func.func @transform_2(%arg0: i32) -> (i32, i32) {
    %c0_i32 = arith.constant 0 : i32
    %c0_i32_0 = arith.constant 0 : i32
    %c0_i32_1 = arith.constant 0 : i32
    return %c0_i32, %c0_i32_0 : i32, i32
  }
  func.func @transform_3(%arg0: i32) -> (i32, i32) {
    %c0_i32 = arith.constant 0 : i32
    %c0_i32_0 = arith.constant 0 : i32
    return %c0_i32, %arg0 : i32, i32
  }
}

</mosaic_0001>

<bundles_post_ra>
// kernel: tpu_custom_call.1
= control target key start
LH: loop header
LB: loop body
LE: loop exit
PB: predicated region body
PF: predicated region fallthrough
CT: control target
= control target key end

     0   :  { %8 = vsyncpa [#allocation3], 0  ;;  %s801_s0 = inlined_call_operand.hbm [shape: f32[8,16], index: 0, kind: input, shape index: {}]   ;;  %s802_s1 = inlined_call_operand.hbm [shape: f32[8,8], index: 1, kind: input, shape index: {}]   ;;  %s803_s2 = inlined_call_operand.hbm [shape: f32[288,128], index: 2, kind: input, shape index: {}]   ;;  %s804_s3 = inlined_call_operand.hbm [shape: f32[1,8], index: 3, kind: output, shape index: {}]  }
   0x1   :  { %9 = vsyncpa [#allocation6], 0 }
   0x2   :  { %10 = vsyncpa [#allocation4], 0  ;;  %s714_s12 = smov [#allocation5]   ;;  %s715_s14 = smov [#allocation2]  }
   0x3   :  { %s27_s13 = sshll.u32 %s714_s12, 4  ;;  %s17_s15 = sshll.u32 %s715_s14, 4  ;;  %s28_s13 = int_to_ptr.vmem [resolvable:$true] %s27_s13  ;;  %s18_s15 = int_to_ptr.vmem [resolvable:$true] %s17_s15 }
   0x4   :  { %s636_s16 = scalar_lea.vmem %s28_s13, 128  ;;  %p641_p1 = scmp.lt.s32.totalorder %s28_s13, %s28_s13 }
   0x5   :  { %p637_p0 = scmp.ne.s32.totalorder %s28_s13, %s636_s16  ;;  %p642_p2 = scmp.lt.s32.totalorder %s636_s16, %s636_s16 }
   0x7   :  { %p643_p3 = por %p642_p2, %p641_p1 }
   0x9   :  { %p644_p4 = pnand %p643_p3, %p637_p0 }
   0xb   :  { %647 = shalt.err (!%p644_p4)
}
   0xc   :  { %30 = dma.hbm_to_vmem [thread:$0]  %s802_s1, 128, %s28_s13, [#allocation6]  }
   0xd   :  { %s656_s19 = scalar_lea.vmem %s18_s15, 128  ;;  %p661_p6 = scmp.lt.s32.totalorder %s18_s15, %s18_s15 }
   0xe   :  { %p657_p5 = scmp.ne.s32.totalorder %s18_s15, %s656_s19  ;;  %p662_p7 = scmp.lt.s32.totalorder %s656_s19, %s656_s19 }
  0x10   :  { %p663_p8 = por %p662_p7, %p661_p6 }
  0x12   :  { %p664_p9 = pnand %p663_p8, %p657_p5 }
  0x14   :  { %667 = shalt.err (!%p664_p9)
}
  0x15   :  { %20 = dma.hbm_to_vmem [thread:$0]  %s801_s0, 128, %s18_s15, [#allocation3]  }
  0x16   :  { %s716_s22 = smov [#allocation7]  }
  0x17   :  { %s36_s23 = sshll.u32 %s716_s22, 4  ;;  %s37_s23 = int_to_ptr.vmem [resolvable:$true] %s36_s23 }
  0x18   :  { %s676_s24 = scalar_lea.vmem %s37_s23, 4608  ;;  %p681_p11 = scmp.lt.s32.totalorder %s37_s23, %s37_s23 }
  0x19   :  { %p677_p10 = scmp.ne.s32.totalorder %s37_s23, %s676_s24  ;;  %p682_p12 = scmp.lt.s32.totalorder %s676_s24, %s676_s24 }
  0x1b   :  { %p683_p13 = por %p682_p12, %p681_p11 }
  0x1d   :  { %p684_p0 = pnand %p683_p13, %p677_p10 }
  0x1f   :  { %687 = shalt.err (!%p684_p0)
}
  0x20   :  { %s717_s1 = smov 128   ;;  %s718_s25 = smov 8  }
  0x21   :  { %42 = dma.hbm_to_vmem [thread:$0]  %s803_s2, 4608, %s37_s23, [#allocation6], %s717_s1, %s717_s1, %s718_s25  }
  0x22   :  { %708 = dma.done.wait [#allocation3], 128  }
  0x23   :  { %709 = vsyncadd [#allocation3], 4294967168 }
  0x24   :  { %710 = dma.done.wait [#allocation6], 4736  }
  0x25   :  { %711 = vsyncadd [#allocation6], 4294962560  ;;  %v719_v0 = vmov 0.0   ;;  %vm720_vm0 = vmmov 0   ;;  %vm58_vm1 = vcmask 64512   ;;  %v57_v1 = vld [vmem:[#allocation7 + $0x10] sm:$0xff]  ;;  %v206_v35 = vlaneseq }
  0x26   :  { %531 = vmatprep.subr.mxu0 %v719_v0  ;;  %536 = vmatprep.subr.mxu1 %v719_v0  ;;  %v55_v2 = vld [vmem:[#allocation7 + $0x8] sm:$0xff]  ;;  %v56_v3 = vld [vmem:[#allocation5] sm:$0xff]  ;;  %v54_v4 = vld [vmem:[#allocation7] sm:$0xff]  ;;  %vm132_vm2 = vcmask 130048   ;;  %v721_v56 = vmov 0   ;;  %s722_s0 = smov [#allocation8]  }
  0x27   :  { %533 = vmatprep.mubr.msk.f32.mxu0 %vm720_vm0, %v719_v0  ;;  %540 = vmatprep.mubr.msk.f32.mxu1 %vm720_vm0, %v719_v0  ;;  %v53_v5 = vld [vmem:[#allocation2] sm:$0xff]  ;;  %v226_v7 = vld [vmem:[#allocation7 + $0x88] sm:$0xff]  ;;  %v225_v8 = vld [vmem:[#allocation7 + $0x80] sm:$0xff]  ;;  %v207_v36 = vshrl.u32 %v206_v35, 7  ;;  %s478_s2 = sshll.u32 %s722_s0, 4  ;;  %vm470_vm3 = vcmask 57344   ;;  %s479_s2 = int_to_ptr.vmem [resolvable:$true] %s478_s2 }
  0x28   :  { %532 = vmatpush3.msra.mxu0 %v57_v1  ;;  %537 = vmatpush3.msra.mxu1 %v55_v2  ;;  %v227_v6 = vld [vmem:[#allocation7 + $0x90] sm:$0xff]  ;;  %v224_v9 = vld [vmem:[#allocation7 + $0x78] sm:$0xff]  ;;  %v222_v11 = vld [vmem:[#allocation7 + $0x68] sm:$0xff]  ;;  %s688_s28 = scalar_lea.vmem %s479_s2, 16  ;;  %s692_s29 = scalar_lea.vmem %s479_s2, 32 }
  0x29   :  { %534 = vmatmul.mubr.msk.f32.vlgmr.msra.gmra.mxu0 %vm58_vm1, %v56_v3  ;;  %538 = vmatprep.subr.mxu1 %v719_v0  ;;  %v223_v10 = vld [vmem:[#allocation7 + $0x70] sm:$0xff]  ;;  %v221_v12 = vld [vmem:[#allocation7 + $0x60] sm:$0xff]  ;;  %v220_v13 = vld [vmem:[#allocation7 + $0x58] sm:$0xff]  ;;  %v208_v37 = vsub.s32 1, %v207_v36  ;;  %v230_v50 = vsub.s32 2, %v207_v36  ;;  %v321_v57 = vsub.s32 3, %v207_v36  ;;  %p689_p1 = scmp.ne.s32.totalorder %s479_s2, %s688_s28  ;;  %p693_p2 = scmp.lt.s32.totalorder %s479_s2, %s479_s2 }
  0x2a   :  { %539 = vmatpush3.msra.mxu1 %v54_v4  ;;  %543 = vmatprep.subr.mxu0 %v719_v0  ;;  %v219_v14 = vld [vmem:[#allocation7 + $0x50] sm:$0xff]  ;;  %v218_v15 = vld [vmem:[#allocation7 + $0x48] sm:$0xff]  ;;  %v217_v16 = vld [vmem:[#allocation7 + $0x40] sm:$0xff]  ;;  %p694_p3 = scmp.lt.s32.totalorder %s692_s29, %s688_s28 }
  0x2b   :  { %541 = vmatmul.mubr.msk.f32.vlgmr.msra.gmra.mxu1 %vm132_vm2, %v53_v5  ;;  %544 = vmatpush3.msra.mxu0 %v227_v6  ;;  %v216_v17 = vld [vmem:[#allocation7 + $0x38] sm:$0xff]  ;;  %v215_v18 = vld [vmem:[#allocation7 + $0x30] sm:$0xff]  ;;  %v214_v19 = vld [vmem:[#allocation7 + $0x28] sm:$0xff] }
  0x2c   :  { %545 = vmatprep.subr.mxu0 %v719_v0  ;;  %575 = vmatprep.mubr.msk.f32.mxu0 %vm720_vm0, %v719_v0  ;;  %v213_v20 = vld [vmem:[#allocation7 + $0x20] sm:$0xff]  ;;  %v212_v21 = vld [vmem:[#allocation7 + $0x18] sm:$0xff]  ;;  %v318_v22 = vld [vmem:[#allocation7 + $0x110] sm:$0xff]  ;;  %p695_p4 = por %p694_p3, %p693_p2 }
  0x2d   :  { %546 = vmatpush3.msra.mxu0 %v226_v7  ;;  %578 = vmatprep.subr.mxu1 %v719_v0  ;;  %v317_v23 = vld [vmem:[#allocation7 + $0x108] sm:$0xff]  ;;  %v316_v24 = vld [vmem:[#allocation7 + $0x100] sm:$0xff]  ;;  %v315_v25 = vld [vmem:[#allocation7 + $0xf8] sm:$0xff] }
  0x2e   :  { %547 = vmatprep.subr.mxu0 %v719_v0  ;;  %610 = vmatprep.mubr.msk.f32.mxu1 %vm720_vm0, %v719_v0  ;;  %v314_v26 = vld [vmem:[#allocation7 + $0xf0] sm:$0xff]  ;;  %v313_v27 = vld [vmem:[#allocation7 + $0xe8] sm:$0xff]  ;;  %v312_v28 = vld [vmem:[#allocation7 + $0xe0] sm:$0xff]  ;;  %p696_p5 = pnand %p695_p4, %p689_p1 }
  0x2f   :  { %548 = vmatpush3.msra.mxu0 %v225_v8  ;;  %579 = vmatpush3.msra.mxu1 %v318_v22  ;;  %v311_v29 = vld [vmem:[#allocation7 + $0xd8] sm:$0xff]  ;;  %v310_v30 = vld [vmem:[#allocation7 + $0xd0] sm:$0xff]  ;;  %v309_v31 = vld [vmem:[#allocation7 + $0xc8] sm:$0xff] }
  0x30   :  { %549 = vmatprep.subr.mxu0 %v719_v0  ;;  %580 = vmatprep.subr.mxu1 %v719_v0  ;;  %v308_v32 = vld [vmem:[#allocation7 + $0xc0] sm:$0xff]  ;;  %v307_v33 = vld [vmem:[#allocation7 + $0xb8] sm:$0xff]  ;;  %v306_v34 = vld [vmem:[#allocation7 + $0xb0] sm:$0xff] }
  0x31   :  { %550 = vmatpush3.msra.mxu0 %v224_v9  ;;  %581 = vmatpush3.msra.mxu1 %v317_v23  ;;  %v52_v38 = vld [vmem:[#allocation7 + $0x118] sm:$0xff]  ;;  %v305_v47 = vld [vmem:[#allocation7 + $0xa8] sm:$0xff]  ;;  %v304_v48 = vld [vmem:[#allocation7 + $0xa0] sm:$0xff] }
  0x32   :  { %551 = vmatprep.subr.mxu0 %v719_v0  ;;  %582 = vmatprep.subr.mxu1 %v719_v0  ;;  %v209_v40 = vrot.slane %v52_v38, %v208_v37  ;;  %v303_v49 = vld [vmem:[#allocation7 + $0x98] sm:$0xff]  ;;  %v231_v51 = vrot.slane %v52_v38, %v230_v50  ;;  %v322_v58 = vrot.slane %v52_v38, %v321_v57 }
  0x33   :  { %552 = vmatpush3.msra.mxu0 %v223_v10  ;;  %583 = vmatpush3.msra.mxu1 %v316_v24 }
  0x34   :  { %553 = vmatprep.subr.mxu0 %v719_v0  ;;  %584 = vmatprep.subr.mxu1 %v719_v0 }
  0x35   :  { %554 = vmatpush3.msra.mxu0 %v222_v11  ;;  %585 = vmatpush3.msra.mxu1 %v315_v25 }
  0x36   :  { %555 = vmatprep.subr.mxu0 %v719_v0  ;;  %586 = vmatprep.subr.mxu1 %v719_v0 }
  0x37   :  { %556 = vmatpush3.msra.mxu0 %v221_v12  ;;  %587 = vmatpush3.msra.mxu1 %v314_v26 }
  0x38   :  { %557 = vmatprep.subr.mxu0 %v719_v0  ;;  %588 = vmatprep.subr.mxu1 %v719_v0 }
  0x39   :  { %558 = vmatpush3.msra.mxu0 %v220_v13  ;;  %589 = vmatpush3.msra.mxu1 %v313_v27 }
  0x3a   :  { %559 = vmatprep.subr.mxu0 %v719_v0  ;;  %590 = vmatprep.subr.mxu1 %v719_v0 }
  0x3b   :  { %560 = vmatpush3.msra.mxu0 %v219_v14  ;;  %591 = vmatpush3.msra.mxu1 %v312_v28 }
  0x3c   :  { %561 = vmatprep.subr.mxu0 %v719_v0  ;;  %592 = vmatprep.subr.mxu1 %v719_v0 }
  0x3d   :  { %562 = vmatpush3.msra.mxu0 %v218_v15  ;;  %593 = vmatpush3.msra.mxu1 %v311_v29 }
  0x3e   :  { %563 = vmatprep.subr.mxu0 %v719_v0  ;;  %594 = vmatprep.subr.mxu1 %v719_v0 }
  0x3f   :  { %564 = vmatpush3.msra.mxu0 %v217_v16  ;;  %595 = vmatpush3.msra.mxu1 %v310_v30 }
  0x40   :  { %565 = vmatprep.subr.mxu0 %v719_v0  ;;  %596 = vmatprep.subr.mxu1 %v719_v0 }
  0x41   :  { %566 = vmatpush3.msra.mxu0 %v216_v17  ;;  %597 = vmatpush3.msra.mxu1 %v309_v31 }
  0x42   :  { %567 = vmatprep.subr.mxu0 %v719_v0  ;;  %598 = vmatprep.subr.mxu1 %v719_v0 }
  0x43   :  { %568 = vmatpush3.msra.mxu0 %v215_v18  ;;  %599 = vmatpush3.msra.mxu1 %v308_v32 }
  0x44   :  { %569 = vmatprep.subr.mxu0 %v719_v0  ;;  %600 = vmatprep.subr.mxu1 %v719_v0 }
  0x45   :  { %570 = vmatpush3.msra.mxu0 %v214_v19  ;;  %601 = vmatpush3.msra.mxu1 %v307_v33 }
  0x46   :  { %571 = vmatprep.subr.mxu0 %v719_v0  ;;  %602 = vmatprep.subr.mxu1 %v719_v0 }
  0x47   :  { %572 = vmatpush3.msra.mxu0 %v213_v20  ;;  %603 = vmatpush3.msra.mxu1 %v306_v34 }
  0x48   :  { %573 = vmatprep.subr.mxu0 %v719_v0  ;;  %604 = vmatprep.subr.mxu1 %v719_v0 }
  0x49   :  { %574 = vmatpush3.msra.mxu0 %v212_v21  ;;  %605 = vmatpush3.msra.mxu1 %v305_v47 }
  0x4a   :  { %613 = vmatprep.subr.mxu0 %v719_v0  ;;  %606 = vmatprep.subr.mxu1 %v719_v0 }
  0x4b   :  { %607 = vmatpush3.msra.mxu1 %v304_v48  ;;  %627 = vset.pattern.permute.xlu0 %v721_v56 }
  0x4c   :  { %608 = vmatprep.subr.mxu1 %v719_v0  ;;  %396 = vperm.xlu0 %627, %v52_v38  }
  0x4d   :  { %609 = vmatpush3.msra.mxu1 %v303_v49 }
  0xc7   :  { %v397_v63 = vpop.permute.xlu0 %396 }
  0xe9   :  { %v128_v39 = vpop.f32.mrf.mxu0 }
  0xeb   :  { %v535_v41 = vpop.f32.mrf.mxu0  ;;  %v202_v42 = vpop.f32.mrf.mxu1 }
  0xec   :  { %v203_v43 = vadd.f32 %v202_v42, %v128_v39 }
  0xed   :  { %v542_v44 = vpop.f32.mrf.mxu1 }
  0xee   :  { %v210_v45 = vadd.f32 %v209_v40, %v203_v43 }
  0xf0   :  { %v211_v46 = vmax.f32 %v210_v45, 0.0 }
  0xf2   :  { %576 = vmatmul.mubr.f32.vlgmr.msra.gmra.mxu0 %v211_v46 }
  0xf3   :  { %615 = vmatprep.mubr.msk.f32.mxu0 %vm720_vm0, %v719_v0  ;;  %v398_v0 = vrot.slane %v397_v63, 4 }
 0x1b2   :  { %v298_v52 = vpop.f32.mrf.mxu0 }
 0x1b3   :  { %v299_v53 = vadd.f32 %v298_v52, %v231_v51 }
 0x1b4   :  { %v577_v54 = vpop.f32.mrf.mxu0 }
 0x1b5   :  { %v302_v55 = vmax.f32 %v299_v53, 0.0 }
 0x1b7   :  { %611 = vmatmul.mubr.f32.vlgmr.msra.gmra.mxu1 %v302_v55 }
 0x277   :  { %v389_v59 = vpop.f32.mrf.mxu1 }
 0x278   :  { %v390_v60 = vadd.f32 %v389_v59, %v322_v58 }
 0x279   :  { %v612_v61 = vpop.f32.mrf.mxu1 }
 0x27a   :  { %v393_v62 = vmax.f32 %v390_v60, 0.0 }
 0x27c   :  { %614 = vmatpush3.xpose.msra.mxu0 %v393_v62 }
 0x27f   :  { %616 = vmatmul.mubr.f32.vlgmr.msra.gmra.mxu0 %v52_v38 }
 0x33f   :  { %v466_v1 = vpop.f32.mrf.mxu0 }
 0x340   :  { %v467_v2 = vadd.f32 %v466_v1, %v398_v0 }
 0x341   :  { %v617_v3 = vpop.f32.mrf.mxu0 }
 0x342   :  { %471 = vst.msk [vmem:[#allocation8] sm:$0x1] %vm470_vm3, %v467_v2 }
 0x343   :  { %699 = shalt.err (!%p696_p5)
}
 0x344   :  { %481 = dma.vmem_to_hbm [thread:$0]  %s479_s2, 16, %s804_s3, [#allocation4]  }
 0x345   :  { %712 = dma.done.wait [#allocation4], 16  }
 0x346   :  { %713 = vsyncadd [#allocation4], 4294967280 }
 0x347   :  { %485 = vsyncpa [#allocation3], 1 }
 0x348   :  { %486 = vsyncpa [#allocation6], 1 }
 0x349   :  { %487 = vsyncpa [#allocation4], 1 }

</bundles_post_ra>
